<compile_context>
chip_gen: v7x
topology: tpu7x:2x2x1
jax: 0.10.0
libtpu: 0.0.40
codegen_flags: <defaults>
</compile_context>

<pallas_src>
import functools

import jax
import jax.numpy as jnp
from jax.experimental import pallas as pl
from jax.experimental.pallas import tpu as pltpu

_LANES = 128


def _round_up(v, m):
    return ((v + m - 1) // m) * m


def _eltwise_kernel(x_ref, add_ref, sub_ref, mul_ref, div_ref, gt_ref, lt_ref):
    x = x_ref[...]
    xf = x.astype(jnp.float32)            # compute in f32 (no bf16 VPU on v5e)
    out_dt = add_ref.dtype
    add_ref[...] = (xf + 2.0).astype(out_dt)
    sub_ref[...] = (xf - 2.0).astype(out_dt)
    mul_ref[...] = (xf * 2.0).astype(out_dt)
    div_ref[...] = (xf * 0.5).astype(out_dt)
    gt_ref[...] = (xf > 1.0).astype(gt_ref.dtype)
    lt_ref[...] = (xf < 1.0).astype(lt_ref.dtype)


@functools.lru_cache(maxsize=None)
def _tile_params():
    """Per-generation (max_tile_rows, vmem_limit_bytes, prefer_even_grid)."""
    vmem_bytes = 64 * 1024 * 1024  # conservative default (v7x-like)
    try:
        info = pltpu.get_tpu_info()
        vmem_bytes = int(getattr(info, "vmem_capacity_bytes", vmem_bytes))
    except Exception:
        pass
    if vmem_bytes >= 100 * 1024 * 1024:
        # v5e / v6e: 128 MiB VMEM, single TensorCore -> big tiles.
        return 8192, 96 * 1024 * 1024, False
    # v7x: 64 MiB VMEM per TC, 2 TCs -> smaller cap, even grid for balance.
    return 4096, 32 * 1024 * 1024, True


@functools.lru_cache(maxsize=None)
def _bool_outputs_supported():
    """Probe whether Mosaic accepts (and correctly lowers) bool-typed outputs."""

    def probe_kernel(x_ref, o_ref):
        o_ref[...] = x_ref[...] > 1.0

    try:
        x = (jnp.arange(8 * _LANES, dtype=jnp.float32).reshape(8, _LANES)
             - 512.0) / 256.0
        got = pl.pallas_call(
            probe_kernel,
            out_shape=jax.ShapeDtypeStruct((8, _LANES), jnp.bool_),
        )(x)
        got = jax.block_until_ready(got)
        return bool(jnp.array_equal(got, x > 1.0))
    except Exception:
        return False


def _choose_tile_rows(rows, max_tile_rows, prefer_even_grid):
    if rows <= 64:
        return rows  # single block (block_shape == full array dims)
    # Aim for >= 2-4 pipeline steps, tiles a multiple of 32 rows (mask tile).
    tile_rows = min(max_tile_rows, max(32, _round_up(pl.cdiv(rows, 4), 32)))
    steps = pl.cdiv(rows, tile_rows)
    if prefer_even_grid and steps > 1 and steps % 2 == 1:
        tile_rows = max(32, _round_up(pl.cdiv(rows, steps + 1), 32))
    return tile_rows


def _run_kernel(x2d, dtype, mask_dtype):
    rows, _ = x2d.shape
    max_tile_rows, vmem_limit, prefer_even = _tile_params()
    tile_rows = _choose_tile_rows(rows, max_tile_rows, prefer_even)
    grid = (pl.cdiv(rows, tile_rows),)

    def blk():
        return pl.BlockSpec((tile_rows, _LANES), lambda i: (i, 0))

    val_struct = jax.ShapeDtypeStruct((rows, _LANES), dtype)
    msk_struct = jax.ShapeDtypeStruct((rows, _LANES), mask_dtype)

    n = rows * _LANES
    itemsize = jnp.dtype(dtype).itemsize
    cost = pl.CostEstimate(
        flops=6 * n,
        transcendentals=0,
        bytes_accessed=n * (5 * itemsize + 2),
    )

    return pl.pallas_call(
        _eltwise_kernel,
        out_shape=(val_struct, val_struct, val_struct, val_struct,
                   msk_struct, msk_struct),
        grid=grid,
        in_specs=[blk()],
        out_specs=tuple(blk() for _ in range(6)),
        compiler_params=pltpu.CompilerParams(
            dimension_semantics=("parallel",),
            vmem_limit_bytes=vmem_limit,
        ),
        cost_estimate=cost,
    )(x2d)


def pt_module_forward(x):
    """Reproduces PtModule.forward: returns (x+2, x-2, x*2, x/2, x>1, x<1)."""
    # TODO(synk): integer inputs would need float promotion for x/2 to match
    # torch true-division semantics; this path assumes a floating-point dtype.
    orig_shape = x.shape
    dtype = x.dtype
    n = x.size

    def jnp_ref(v):
        return (v + 2, v - 2, v * 2, v * 0.5, v > 1, v < 1)

    if n < _LANES:
        # Tiny input: not worth a kernel launch.
        return jnp_ref(x)

    use_bool = _bool_outputs_supported()
    mask_dtype = jnp.bool_ if use_bool else jnp.int8

    x_flat = x.reshape(-1)
    n_main = (n // _LANES) * _LANES
    tail = n - n_main

    x_main = x_flat if tail == 0 else x_flat[:n_main]
    x2d = x_main.reshape(n_main // _LANES, _LANES)

    outs = _run_kernel(x2d, dtype, mask_dtype)
    flat_outs = [o.reshape(-1) for o in outs]

    if tail:
        # Only the <128-element ragged tail is computed outside the kernel.
        x_tail = x_flat[n_main:]
        tail_outs = jnp_ref(x_tail)
        flat_outs = [
            jnp.concatenate([m, t.astype(m.dtype)])
            for m, t in zip(flat_outs, tail_outs)
        ]

    results = [o.reshape(orig_shape) for o in flat_outs]
    if not use_bool:
        results[4] = results[4].astype(jnp.bool_)
        results[5] = results[5].astype(jnp.bool_)
    return tuple(results)


if __name__ == "__main__":
    key = jax.random.PRNGKey(0)
    # Small NCHW input consistent with the module (elementwise, shape-agnostic).
    x = jax.random.normal(key, (2, 4, 16, 16), dtype=jnp.float32) * 2.0

    fwd = jax.jit(pt_module_forward)
    outs = jax.block_until_ready(fwd(x))

    # Sanity check against plain JAX reference.
    ref = (x + 2, x - 2, x * 2, x / 2, x > 1, x < 1)
    for got, want in zip(outs, ref):
        assert got.shape == want.shape and got.dtype == want.dtype
        if got.dtype == jnp.bool_:
            assert bool(jnp.all(got == want))
        else:
            assert bool(jnp.allclose(got, want, atol=1e-6))

    print("KERNEL_OK")
</pallas_src>

<mosaic_0001>
module attributes {stable_mosaic.version = 11 : i64} {
  func.func @_eltwise_kernel(%arg0: i32, %arg1: memref<16x128xf32, #tpu.memory_space<vmem>>, %arg2: memref<16x128xf32, #tpu.memory_space<vmem>>, %arg3: memref<16x128xf32, #tpu.memory_space<vmem>>, %arg4: memref<16x128xf32, #tpu.memory_space<vmem>>, %arg5: memref<16x128xf32, #tpu.memory_space<vmem>>, %arg6: memref<16x128xi8, #tpu.memory_space<vmem>>, %arg7: memref<16x128xi8, #tpu.memory_space<vmem>>) attributes {dimension_semantics = [#tpu.dimension_semantics<parallel>], iteration_bounds = array<i64: 1>, scalar_prefetch = 0 : i64, scratch_operands = 0 : i64, tpu.core_type = #tpu.core_type<tc>, window_params = [{transform_indices = @transform_0, window_bounds = array<i64: 16, 128>}, {transform_indices = @transform_1, window_bounds = array<i64: 16, 128>}, {transform_indices = @transform_2, window_bounds = array<i64: 16, 128>}, {transform_indices = @transform_3, window_bounds = array<i64: 16, 128>}, {transform_indices = @transform_4, window_bounds = array<i64: 16, 128>}, {transform_indices = @transform_5, window_bounds = array<i64: 16, 128>}, {transform_indices = @transform_6, window_bounds = array<i64: 16, 128>}]} {
    %c0 = arith.constant 0 : index
    %c0_0 = arith.constant 0 : index
    %0 = vector.load %arg1[%c0, %c0_0] : memref<16x128xf32, #tpu.memory_space<vmem>>, vector<16x128xf32>
    %cst = arith.constant 2.000000e+00 : f32
    %1 = vector.broadcast %cst : f32 to vector<16x128xf32>
    %2 = arith.addf %0, %1 : vector<16x128xf32>
    %c0_1 = arith.constant 0 : index
    %c0_2 = arith.constant 0 : index
    %3 = vector.load %arg2[%c0_1, %c0_2] : memref<16x128xf32, #tpu.memory_space<vmem>>, vector<16x128xf32>
    tpu.vector_store %arg2[%c0_1, %c0_2], %2 {strides = array<i32>} : memref<16x128xf32, #tpu.memory_space<vmem>>, vector<16x128xf32>,
    %cst_3 = arith.constant 2.000000e+00 : f32
    %4 = vector.broadcast %cst_3 : f32 to vector<16x128xf32>
    %5 = arith.subf %0, %4 : vector<16x128xf32>
    %c0_4 = arith.constant 0 : index
    %c0_5 = arith.constant 0 : index
    %6 = vector.load %arg3[%c0_4, %c0_5] : memref<16x128xf32, #tpu.memory_space<vmem>>, vector<16x128xf32>
    tpu.vector_store %arg3[%c0_4, %c0_5], %5 {strides = array<i32>} : memref<16x128xf32, #tpu.memory_space<vmem>>, vector<16x128xf32>,
    %cst_6 = arith.constant 2.000000e+00 : f32
    %7 = vector.broadcast %cst_6 : f32 to vector<16x128xf32>
    %8 = arith.mulf %0, %7 : vector<16x128xf32>
    %c0_7 = arith.constant 0 : index
    %c0_8 = arith.constant 0 : index
    %9 = vector.load %arg4[%c0_7, %c0_8] : memref<16x128xf32, #tpu.memory_space<vmem>>, vector<16x128xf32>
    tpu.vector_store %arg4[%c0_7, %c0_8], %8 {strides = array<i32>} : memref<16x128xf32, #tpu.memory_space<vmem>>, vector<16x128xf32>,
    %cst_9 = arith.constant 5.000000e-01 : f32
    %10 = vector.broadcast %cst_9 : f32 to vector<16x128xf32>
    %11 = arith.mulf %0, %10 : vector<16x128xf32>
    %c0_10 = arith.constant 0 : index
    %c0_11 = arith.constant 0 : index
    %12 = vector.load %arg5[%c0_10, %c0_11] : memref<16x128xf32, #tpu.memory_space<vmem>>, vector<16x128xf32>
    tpu.vector_store %arg5[%c0_10, %c0_11], %11 {strides = array<i32>} : memref<16x128xf32, #tpu.memory_space<vmem>>, vector<16x128xf32>,
    %cst_12 = arith.constant 1.000000e+00 : f32
    %13 = vector.broadcast %cst_12 : f32 to vector<16x128xf32>
    %14 = arith.cmpf ogt, %0, %13 : vector<16x128xf32>
    %15 = arith.extui %14 : vector<16x128xi1> to vector<16x128xi8>
    %c0_13 = arith.constant 0 : index
    %c0_14 = arith.constant 0 : index
    %16 = vector.load %arg6[%c0_13, %c0_14] : memref<16x128xi8, #tpu.memory_space<vmem>>, vector<16x128xi8>
    tpu.vector_store %arg6[%c0_13, %c0_14], %15 {strides = array<i32>} : memref<16x128xi8, #tpu.memory_space<vmem>>, vector<16x128xi8>,
    %cst_15 = arith.constant 1.000000e+00 : f32
    %17 = vector.broadcast %cst_15 : f32 to vector<16x128xf32>
    %18 = arith.cmpf olt, %0, %17 : vector<16x128xf32>
    %19 = arith.extui %18 : vector<16x128xi1> to vector<16x128xi8>
    %c0_16 = arith.constant 0 : index
    %c0_17 = arith.constant 0 : index
    %20 = vector.load %arg7[%c0_16, %c0_17] : memref<16x128xi8, #tpu.memory_space<vmem>>, vector<16x128xi8>
    tpu.vector_store %arg7[%c0_16, %c0_17], %19 {strides = array<i32>} : memref<16x128xi8, #tpu.memory_space<vmem>>, vector<16x128xi8>,
    return
  }
  func.func @transform_0(%arg0: i32) -> (i32, i32) {
    %c0_i32 = arith.constant 0 : i32
    %c0_i32_0 = arith.constant 0 : i32
    return %arg0, %c0_i32 : i32, i32
  }
  func.func @transform_1(%arg0: i32) -> (i32, i32) {
    %c0_i32 = arith.constant 0 : i32
    %c0_i32_0 = arith.constant 0 : i32
    return %arg0, %c0_i32 : i32, i32
  }
  func.func @transform_2(%arg0: i32) -> (i32, i32) {
    %c0_i32 = arith.constant 0 : i32
    %c0_i32_0 = arith.constant 0 : i32
    return %arg0, %c0_i32 : i32, i32
  }
  func.func @transform_3(%arg0: i32) -> (i32, i32) {
    %c0_i32 = arith.constant 0 : i32
    %c0_i32_0 = arith.constant 0 : i32
    return %arg0, %c0_i32 : i32, i32
  }
  func.func @transform_4(%arg0: i32) -> (i32, i32) {
    %c0_i32 = arith.constant 0 : i32
    %c0_i32_0 = arith.constant 0 : i32
    return %arg0, %c0_i32 : i32, i32
  }
  func.func @transform_5(%arg0: i32) -> (i32, i32) {
    %c0_i32 = arith.constant 0 : i32
    %c0_i32_0 = arith.constant 0 : i32
    return %arg0, %c0_i32 : i32, i32
  }
  func.func @transform_6(%arg0: i32) -> (i32, i32) {
    %c0_i32 = arith.constant 0 : i32
    %c0_i32_0 = arith.constant 0 : i32
    return %arg0, %c0_i32 : i32, i32
  }
}

</mosaic_0001>

<bundles_post_ra>
// kernel: pt_module_forward.1
= control target key start
LH: loop header
LB: loop body
LE: loop exit
PB: predicated region body
PF: predicated region fallthrough
CT: control target
= control target key end

     0   :  { %v87_v10 = vmov 0   ;;  %s165_s0 = inlined_call_operand.vmem [shape: f32[16,128], index: 0, kind: input, shape index: {}]   ;;  %s166_s1 = inlined_call_operand.vmem [shape: f32[16,128], index: 1, kind: output, shape index: {0}]   ;;  %s167_s2 = inlined_call_operand.vmem [shape: f32[16,128], index: 2, kind: output, shape index: {1}]   ;;  %s168_s3 = inlined_call_operand.vmem [shape: f32[16,128], index: 3, kind: output, shape index: {2}]   ;;  %s169_s4 = inlined_call_operand.vmem [shape: f32[16,128], index: 4, kind: output, shape index: {3}]   ;;  %s170_s5 = inlined_call_operand.vmem [shape: s8[16,128], index: 5, kind: output, shape index: {4}]   ;;  %s171_s6 = inlined_call_operand.vmem [shape: s8[16,128], index: 6, kind: output, shape index: {5}]  }
   0x1   :  { %v16_v0 = vld [vmem:[%s165_s0] sm:$0xff]  ;;  %v17_v1 = vld [vmem:[%s165_s0 + $0x8] sm:$0xff] }
   0x2   :  { %v18_v2 = vadd.f32 2.0, %v16_v0  ;;  %v19_v3 = vadd.f32 2.0, %v17_v1  ;;  %v84_v4 = vadd.f32 -2.0, %v16_v0  ;;  %v85_v5 = vadd.f32 -2.0, %v17_v1 }
   0x3   :  { %v26_v6 = vmul.f32 2.0, %v16_v0  ;;  %v27_v7 = vmul.f32 2.0, %v17_v1  ;;  %v30_v8 = vmul.f32 0.5, %v16_v0  ;;  %v31_v9 = vmul.f32 0.5, %v17_v1 }
   0x4   :  { %20 = vst [vmem:[%s166_s1] sm:$0xff] %v18_v2  ;;  %21 = vst [vmem:[%s166_s1 + $0x8] sm:$0xff] %v19_v3  ;;  %vm34_vm0 = vcmp.gt.f32.partialorder %v16_v0, 1.0  ;;  %vm35_vm1 = vcmp.gt.f32.partialorder %v17_v1, 1.0  ;;  %vm47_vm2 = vcmp.lt.f32.partialorder %v16_v0, 1.0  ;;  %vm48_vm3 = vcmp.lt.f32.partialorder %v17_v1, 1.0 }
   0x5   :  { %24 = vst [vmem:[%s167_s2] sm:$0xff] %v84_v4  ;;  %25 = vst [vmem:[%s167_s2 + $0x8] sm:$0xff] %v85_v5 }
   0x6   :  { %28 = vst [vmem:[%s168_s3] sm:$0xff] %v26_v6  ;;  %29 = vst [vmem:[%s168_s3 + $0x8] sm:$0xff] %v27_v7 }
   0x7   :  { %32 = vst [vmem:[%s169_s4] sm:$0xff] %v30_v8  ;;  %33 = vst [vmem:[%s169_s4 + $0x8] sm:$0xff] %v31_v9 }
   0x8   :  { %vm36_vm4 = vmpackc.low %vm35_vm1, %vm34_vm0 }
   0x9   :  { %vm37_vm5 = vmpackc.even %vm36_vm4, %vm36_vm4 }
   0xa   :  { %v38_v11 = vsel %vm37_vm5, 16843009, %v87_v10  ;;  %vm49_vm6 = vmpackc.low %vm48_vm3, %vm47_vm2 }
   0xb   :  { %v39_v12 = vunpack.c.0.s8 %v38_v11  ;;  %v40_v13 = vunpack.c.1.s8 %v38_v11  ;;  %vm50_vm7 = vmpackc.even %vm49_vm6, %vm49_vm6 }
   0xc   :  { %v51_v14 = vsel %vm50_vm7, 16843009, %v87_v10 }
   0xd   :  { %v41_v15 = vpack.c.b16 %v39_v12, %v39_v12  ;;  %v43_v16 = vpack.c.b16 %v40_v13, %v40_v13  ;;  %v52_v17 = vunpack.c.0.s8 %v51_v14  ;;  %v53_v18 = vunpack.c.1.s8 %v51_v14 }
   0xf   :  { %v42_v19 = vpack.c.b8 %v41_v15, %v41_v15  ;;  %v44_v20 = vpack.c.b8 %v43_v16, %v43_v16  ;;  %v54_v21 = vpack.c.b16 %v52_v17, %v52_v17  ;;  %v56_v22 = vpack.c.b16 %v53_v18, %v53_v18 }
  0x11   :  { %45 = vst [vmem:[%s170_s5] sm:$0x3] %v42_v19  ;;  %46 = vst [vmem:[%s170_s5 + $0x2] sm:$0x3] %v44_v20  ;;  %v55_v23 = vpack.c.b8 %v54_v21, %v54_v21  ;;  %v57_v24 = vpack.c.b8 %v56_v22, %v56_v22 }
  0x13   :  { %58 = vst [vmem:[%s171_s6] sm:$0x3] %v55_v23  ;;  %59 = vst [vmem:[%s171_s6 + $0x2] sm:$0x3] %v57_v24 }

</bundles_post_ra>
